<compile_context>
chip_gen: v5e
topology: v5e:2x2
jax: 0.10.0
libtpu: 0.0.40
codegen_flags: <defaults>
</compile_context>

<pallas_src>
import functools
import math
from types import SimpleNamespace

import jax
import jax.numpy as jnp
from jax import lax
from jax.experimental import pallas as pl
from jax.experimental.pallas import tpu as pltpu


_VMEM_BUDGET = 26 * 1024 * 1024   # summed tile buffers + elementwise intermediates
_VMEM_LIMIT = 48 * 1024 * 1024    # scoped-VMEM ceiling requested from Mosaic (< v7x 64 MiB)


def _round_up(x, m):
    return ((x + m - 1) // m) * m


def _pick_tiles(B, N, D, *, mxu, gathered):
    """Returns (tb, tn, b_pad).  tb is a multiple of 8 (sublanes); tn is a multiple of
    128 (lane-dense output stores) unless N < 128, in which case tn == N (full dim)."""
    b8 = _round_up(B, 8)
    if N <= 128:
        tn_opts = [N]
    else:
        cap = (N // 128) * 128
        tn_opts = []
        for c in (2048, 1024, 512, 256, 128):
            c = min(c, cap)
            if c not in tn_opts:
                tn_opts.append(c)

    if mxu:
        # MXU path (shared-table dot score): only the double-buffered tail tile,
        # query tile and output tile live in VMEM.
        if b8 <= 128:
            tb = b8
        elif b8 % 256 == 0:
            tb = 256
        else:
            tb = 128
        tn = tn_opts[-1]
        for c in tn_opts:
            if 2 * c * D * 4 + 2 * tb * D * 4 + 3 * tb * c * 4 <= _VMEM_BUDGET:
                tn = c
                break
    else:
        # Elementwise path (TransE / RotatE / all gathered tails): must also budget the
        # (tb, tn, D) broadcast intermediates so realistic D fits v7x's 64 MiB VMEM.
        tb0 = min(b8, 32)
        tb_opts = []
        for t in (tb0, 16, 8):
            if t <= tb0 and t not in tb_opts:
                tb_opts.append(t)
        tb, tn = tb_opts[-1], tn_opts[-1]
        done = False
        for c in tn_opts:
            for t in tb_opts:
                tail_tile = (t if gathered else 1) * c * D * 4
                inter = 3 * t * c * D * 4                      # broadcast temporaries
                use = 2 * tail_tile + 2 * t * D * 4 + 2 * t * c * 4 + inter
                if use <= _VMEM_BUDGET:
                    tb, tn, done = t, c, True
                    break
            if done:
                break
        # TODO(synk): for very large D (> ~1500) chunk D inside the kernel with a
        # fori_loop partial-sum instead of relying on the raised vmem limit.

    # v7x has 2 TensorCores: avoid a (1, 1) grid when a dimension can be split cleanly.
    if pl.cdiv(N, tn) == 1 and _round_up(B, tb) // tb == 1:
        if tn % 256 == 0:
            tn //= 2
        elif tb >= 16 and (tb // 2) % 8 == 0:
            tb //= 2
    return tb, tn, _round_up(B, tb)


# ---------------- score kernels ----------------
# t_ref is (tn, D) when the tail set is the shared full entity table, or (tb, tn, D)
# for gathered negative tails (static ndim branch picked at trace time).

def _dot_kernel(q_ref, t_ref, o_ref):
    """score[b, n] = sum_d q[b, d] * t[..., n, d].
    Shared table (2-D tail) -> one MXU matmul, bf16 operands, f32 accumulation.
    Gathered (3-D tail)     -> VPU multiply + reduce (memory-bound path)."""
    t = t_ref[...]
    if t.ndim == 2:
        o_ref[...] = lax.dot_general(
            q_ref[...].astype(jnp.bfloat16), t.astype(jnp.bfloat16),
            (((1,), (1,)), ((), ())), preferred_element_type=jnp.float32)
    else:
        # Memory-bound: each tail element is used once, so the VPU reduce is fine.
        q = q_ref[...].astype(jnp.float32)
        o_ref[...] = jnp.sum(q[:, None, :] * t.astype(jnp.float32), axis=2)


def _dist_kernel(q_ref, t_ref, o_ref, *, gamma, complex_norm):
    """TransE: gamma - ||q - t||_1.
    RotatE: q = [re | im] of the rotated head; score = gamma - sum_k |q_k - t_k| (complex)."""
    q = q_ref[...].astype(jnp.float32)
    t = t_ref[...].astype(jnp.float32)
    if t.ndim == 2:
        t = t[None, :, :]
    if complex_norm:
        dh = q.shape[1] // 2
        re = q[:, None, :dh] - t[..., :dh]
        im = q[:, None, dh:] - t[..., dh:]
        dist = jnp.sum(jnp.sqrt(re * re + im * im), axis=2)
    else:
        dist = jnp.sum(jnp.abs(q[:, None, :] - t), axis=2)
    o_ref[...] = gamma - dist


# ---------------- tiled pallas_call wrappers ----------------

def _compiler_params():
    return pltpu.CompilerParams(dimension_semantics=("parallel", "parallel"),
                                vmem_limit_bytes=_VMEM_LIMIT)


def _score_shared(mode, q, table, *, gamma=0.0):
    """Score every entity in `table` (N_ent, D) against each query row (full-table path)."""
    B, D = q.shape
    N = table.shape[0]
    mxu = (mode == 'dot')
    tb, tn, b_pad = _pick_tiles(B, N, D, mxu=mxu, gathered=False)
    n_tiles = pl.cdiv(N, tn)
    b_tiles = b_pad // tb

    q_p = jnp.pad(q, ((0, b_pad - B), (0, 0)))

    if mode == 'dot':
        kernel = _dot_kernel
        flops, trans = 2 * b_pad * N * D, 0
    else:
        kernel = functools.partial(_dist_kernel, gamma=gamma,
                                   complex_norm=(mode == 'l2c'))
        flops = 6 * b_pad * N * D
        trans = b_pad * N * (D // 2) if mode == 'l2c' else 0
    bytes_accessed = (n_tiles * b_pad * D * 4            # query re-fetched per tail tile
                      + N * D * table.dtype.itemsize     # entity table streamed once
                      + b_pad * N * 4)                   # scores written once

    out = pl.pallas_call(
        kernel,
        out_shape=jax.ShapeDtypeStruct((b_pad, N), jnp.float32),
        # Tail tiles on the OUTER axis: the (tn, D) table block keeps the same block
        # index across the inner batch axis, so Pallas skips its re-DMA -> the entity
        # table is read from HBM exactly once per call.
        grid=(n_tiles, b_tiles),
        in_specs=[pl.BlockSpec((tb, D), lambda j, i: (i, 0)),
                  pl.BlockSpec((tn, D), lambda j, i: (j, 0))],
        out_specs=pl.BlockSpec((tb, tn), lambda j, i: (i, j)),
        compiler_params=_compiler_params(),
        cost_estimate=pl.CostEstimate(flops=flops, transcendentals=trans,
                                      bytes_accessed=bytes_accessed),
    )(q_p, table)
    return out[:B]


def _score_gathered(mode, q, entity_embedding, tail_idx, *, gamma=0.0):
    """Score gathered tails tail_idx (B, N) (negatives, or N == 1 positive triples)."""
    B, D = q.shape
    N = tail_idx.shape[1]
    tb, tn, b_pad = _pick_tiles(B, N, D, mxu=False, gathered=True)
    n_pad = _round_up(N, tn)

    # Pad the cheap index array (not the gathered tensor), then gather once.
    # TODO(synk): gather tail rows inside the kernel (scalar-prefetch indices + manual
    # row DMA from an ANY-space table) to remove this HBM round trip entirely.
    idx = jnp.pad(tail_idx, ((0, b_pad - B), (0, n_pad - N)))
    tail = entity_embedding[idx]                          # (b_pad, n_pad, D)
    q_p = jnp.pad(q, ((0, b_pad - B), (0, 0)))

    if mode == 'dot':
        kernel = _dot_kernel
        flops, trans = 2 * b_pad * n_pad * D, 0
    else:
        kernel = functools.partial(_dist_kernel, gamma=gamma,
                                   complex_norm=(mode == 'l2c'))
        flops = 6 * b_pad * n_pad * D
        trans = b_pad * n_pad * (D // 2) if mode == 'l2c' else 0
    bytes_accessed = (b_pad * D * 4 + b_pad * n_pad * D * tail.dtype.itemsize
                      + b_pad * n_pad * 4)

    out = pl.pallas_call(
        kernel,
        out_shape=jax.ShapeDtypeStruct((b_pad, n_pad), jnp.float32),
        # Batch tiles on the OUTER axis: the (tb, D) query block stays VMEM-resident
        # across the inner tail axis (its block index is unchanged -> no re-DMA).
        grid=(b_pad // tb, n_pad // tn),
        in_specs=[pl.BlockSpec((tb, D), lambda i, j: (i, 0)),
                  pl.BlockSpec((tb, tn, D), lambda i, j: (i, j, 0))],
        out_specs=pl.BlockSpec((tb, tn), lambda i, j: (i, j)),
        compiler_params=_compiler_params(),
        cost_estimate=pl.CostEstimate(flops=flops, transcendentals=trans,
                                      bytes_accessed=bytes_accessed),
    )(q_p, tail)
    return out[:B, :N]


# ---------------- model wrapper (gather + per-batch query precompute in plain JAX) ------

class KGEModel:
    def __init__(self, args, model_name, key):
        self.model_name = model_name
        self.gamma = float(args.gamma)
        self.embedding_range = float((args.gamma + args.epsilon) / args.hidden_dim)

        d = args.hidden_dim
        f = args.convr_num_filters
        k = args.convr_kernel_size
        assert k == 2, "ConvR's squeeze(2).squeeze(2) requires convr_kernel_size == 2"
        assert d % 2 == 0, "ComplEx / RotatE require an even hidden_dim"

        k1, k2, k3, k4 = jax.random.split(key, 4)
        b_conv = 1.0 / math.sqrt(1 * k * d)
        conv_w = jax.random.uniform(k1, (f, 1, k, d), jnp.float32, -b_conv, b_conv)
        conv_b = jax.random.uniform(k2, (f,), jnp.float32, -b_conv, b_conv)
        b_fc = 1.0 / math.sqrt(f)
        fc_w = jax.random.uniform(k3, (d, f), jnp.float32, -b_fc, b_fc)
        fc_b = jax.random.uniform(k4, (d,), jnp.float32, -b_fc, b_fc)

        # Conv over [head; rel] with a (2, D) kernel == head @ W_head + rel @ W_rel + b.
        self.conv_w_head = conv_w[:, 0, 0, :].T      # (D, F)
        self.conv_w_rel = conv_w[:, 0, 1, :].T       # (D, F)
        self.conv_b = conv_b.reshape(1, f)           # (1, F)
        self.fc_w_t = fc_w.T                         # (F, D)
        self.fc_b = fc_b.reshape(1, d)               # (1, D)

    @property
    def _mode(self):
        return {'TransE': 'l1', 'RotatE': 'l2c'}.get(self.model_name, 'dot')

    def _query(self, head, relation):
        """Hoisted per-batch work (B, D): done once in plain JAX instead of once per
        tail tile inside the kernel (ConvR conv+fc, RotatE cos/sin, ComplEx product)."""
        name = self.model_name
        if name == 'TransE':
            return head + relation
        if name == 'DistMult':
            return head * relation
        if name == 'ComplEx':
            dh = head.shape[1] // 2
            re_h, im_h = head[:, :dh], head[:, dh:]
            re_r, im_r = relation[:, :dh], relation[:, dh:]
            return jnp.concatenate([re_h * re_r - im_h * im_r,
                                    re_h * im_r + im_h * re_r], axis=1)
        if name == 'RotatE':
            dh = head.shape[1] // 2
            assert relation.shape[1] == dh, "RotatE expects relation dim == entity dim // 2"
            re_h, im_h = head[:, :dh], head[:, dh:]
            phase = relation / (self.embedding_range / math.pi)
            cr, sr = jnp.cos(phase), jnp.sin(phase)
            return jnp.concatenate([re_h * cr - im_h * sr,
                                    re_h * sr + im_h * cr], axis=1)
        if name == 'ConvR':
            conv = jnp.maximum(head @ self.conv_w_head + relation @ self.conv_w_rel
                               + self.conv_b, 0.0)
            return conv @ self.fc_w_t + self.fc_b
        raise ValueError(name)

    def forward(self, sample, relation_embedding, entity_embedding, neg=True):
        if not neg:
            head = entity_embedding[sample[:, 0]]
            relation = relation_embedding[sample[:, 1]]
            q = self._query(head, relation)
            tail_idx = sample[:, 2:3]                                  # (B, 1)
            return _score_gathered(self._mode, q, entity_embedding, tail_idx,
                                   gamma=self.gamma)

        head_part, tail_part = sample
        head = entity_embedding[head_part[:, 0]]
        relation = relation_embedding[head_part[:, 1]]
        q = self._query(head, relation)
        if tail_part is None:
            # Full-table scoring: the entity table stays (N_ent, D) in HBM, is never
            # padded/copied, and is streamed exactly once by the swapped grid order.
            return _score_shared(self._mode, q, entity_embedding, gamma=self.gamma)
        return _score_gathered(self._mode, q, entity_embedding, tail_part,
                               gamma=self.gamma)


# ---------------- pure-JAX reference (torch semantics) for validation ----------------

def _reference(name, model, head, relation, tail3):
    h = head[:, None, :]
    r = relation[:, None, :]
    t = tail3
    if name == 'TransE':
        return model.gamma - jnp.sum(jnp.abs(h + r - t), axis=2)
    if name == 'DistMult':
        return jnp.sum(h * r * t, axis=2)
    if name == 'ComplEx':
        dh = head.shape[1] // 2
        re_h, im_h = h[..., :dh], h[..., dh:]
        re_r, im_r = r[..., :dh], r[..., dh:]
        re_t, im_t = t[..., :dh], t[..., dh:]
        return jnp.sum((re_h * re_r - im_h * im_r) * re_t
                       + (re_h * im_r + im_h * re_r) * im_t, axis=2)
    if name == 'RotatE':
        dh = head.shape[1] // 2
        re_h, im_h = h[..., :dh], h[..., dh:]
        re_t, im_t = t[..., :dh], t[..., dh:]
        phase = r / (model.embedding_range / math.pi)
        re_r, im_r = jnp.cos(phase), jnp.sin(phase)
        re_s = re_h * re_r - im_h * im_r - re_t
        im_s = re_h * im_r + im_h * re_r - im_t
        return model.gamma - jnp.sum(jnp.sqrt(re_s * re_s + im_s * im_s), axis=2)
    if name == 'ConvR':
        conv = jnp.maximum(head @ model.conv_w_head + relation @ model.conv_w_rel
                           + model.conv_b, 0.0)
        v = conv @ model.fc_w_t + model.fc_b
        return jnp.sum(v[:, None, :] * t, axis=2)
    raise ValueError(name)


if __name__ == "__main__":
    args = SimpleNamespace(gamma=12.0, epsilon=2.0, hidden_dim=32,
                           convr_num_filters=16, convr_kernel_size=2, gpu=None)

    key = jax.random.PRNGKey(0)
    k_ent, k_rel, k_relh, k_h, k_t, k_model = jax.random.split(key, 6)

    # 200 entities: exercises the ragged last tile of the un-padded shared-table path.
    num_entities, num_relations = 200, 16
    B, N, D = 2, 8, args.hidden_dim

    ent_emb = jax.random.normal(k_ent, (num_entities, D), jnp.float32)
    rel_emb = jax.random.normal(k_rel, (num_relations, D), jnp.float32)
    rel_emb_half = jax.random.normal(k_relh, (num_relations, D // 2), jnp.float32)  # RotatE

    head_part = jax.random.randint(k_h, (B, 2), 0, num_entities).astype(jnp.int32)
    head_part = head_part.at[:, 1].set(head_part[:, 1] % num_relations)
    tail_part = jax.random.randint(k_t, (B, N), 0, num_entities).astype(jnp.int32)

    for name in ['TransE', 'DistMult', 'ComplEx', 'RotatE', 'ConvR']:
        model = KGEModel(args, name, k_model)
        r_emb = rel_emb_half if name == 'RotatE' else rel_emb
        head = ent_emb[head_part[:, 0]]
        rel = r_emb[head_part[:, 1]]

        # gathered negative tails (B, N)
        s_neg = model.forward((head_part, tail_part), r_emb, ent_emb, neg=True)
        jax.block_until_ready(s_neg)
        assert s_neg.shape == (B, N) and s_neg.dtype == jnp.float32
        ref_neg = _reference(name, model, head, rel, ent_emb[tail_part])
        assert float(jnp.max(jnp.abs(s_neg - ref_neg))) < 0.5, name

        # full-entity-table scoring (tail_part is None -> shared-table / MXU path)
        s_all = model.forward((head_part, None), r_emb, ent_emb, neg=True)
        jax.block_until_ready(s_all)
        assert s_all.shape == (B, num_entities) and s_all.dtype == jnp.float32
        ref_all = _reference(name, model, head, rel,
                             jnp.broadcast_to(ent_emb[None], (B, num_entities, D)))
        assert float(jnp.max(jnp.abs(s_all - ref_all))) < 0.5, name

    # positive-triple path (neg=False) -> (B, 1); tail axis is no longer padded to 128.
    sample = jnp.stack([head_part[:, 0], head_part[:, 1], tail_part[:, 0]], axis=1)
    pos = KGEModel(args, 'DistMult', k_model).forward(sample, rel_emb, ent_emb, neg=False)
    jax.block_until_ready(pos)
    assert pos.shape == (B, 1) and pos.dtype == jnp.float32

    print("KERNEL_OK")
</pallas_src>

<mosaic_0001>
module attributes {stable_mosaic.version = 11 : i64} {
  func.func @_dist_kernel(%arg0: i32, %arg1: i32, %arg2: memref<8x32xf32, #tpu.memory_space<vmem>>, %arg3: memref<8x8x32xf32, #tpu.memory_space<vmem>>, %arg4: memref<8x8xf32, #tpu.memory_space<vmem>>) attributes {dimension_semantics = [#tpu.dimension_semantics<parallel>, #tpu.dimension_semantics<parallel>], iteration_bounds = array<i64: 1, 1>, scalar_prefetch = 0 : i64, scratch_operands = 0 : i64, tpu.core_type = #tpu.core_type<tc>, window_params = [{transform_indices = @transform_0, window_bounds = array<i64: 8, 32>}, {transform_indices = @transform_1, window_bounds = array<i64: 8, 8, 32>}, {transform_indices = @transform_2, window_bounds = array<i64: 8, 8>}]} {
    %c0 = arith.constant 0 : index
    %c0_0 = arith.constant 0 : index
    %0 = vector.load %arg2[%c0, %c0_0] : memref<8x32xf32, #tpu.memory_space<vmem>>, vector<8x32xf32>
    %c0_1 = arith.constant 0 : index
    %c0_2 = arith.constant 0 : index
    %c0_3 = arith.constant 0 : index
    %1 = vector.load %arg3[%c0_1, %c0_2, %c0_3] : memref<8x8x32xf32, #tpu.memory_space<vmem>>, vector<8x8x32xf32>
    %2 = vector.shape_cast %0 : vector<8x32xf32> to vector<8x1x32xf32>
    %3 = vector.broadcast %2 : vector<8x1x32xf32> to vector<8x8x32xf32>
    %4 = arith.subf %3, %1 : vector<8x8x32xf32>
    %5 = math.absf %4 : vector<8x8x32xf32>
    %cst = arith.constant dense<0.000000e+00> : vector<8x8xf32>
    %6 = vector.multi_reduction <add>, %5, %cst [2] : vector<8x8x32xf32> to vector<8x8xf32>
    %cst_4 = arith.constant 1.200000e+01 : f32
    %7 = vector.broadcast %cst_4 : f32 to vector<8x8xf32>
    %8 = arith.subf %7, %6 : vector<8x8xf32>
    %c0_5 = arith.constant 0 : index
    %c0_6 = arith.constant 0 : index
    %9 = vector.load %arg4[%c0_5, %c0_6] : memref<8x8xf32, #tpu.memory_space<vmem>>, vector<8x8xf32>
    tpu.vector_store %arg4[%c0_5, %c0_6], %8 {strides = array<i32>} : memref<8x8xf32, #tpu.memory_space<vmem>>, vector<8x8xf32>,
    return
  }
  func.func @transform_0(%arg0: i32, %arg1: i32) -> (i32, i32) {
    %c0_i32 = arith.constant 0 : i32
    %c0_i32_0 = arith.constant 0 : i32
    return %arg0, %c0_i32 : i32, i32
  }
  func.func @transform_1(%arg0: i32, %arg1: i32) -> (i32, i32, i32) {
    %c0_i32 = arith.constant 0 : i32
    %c0_i32_0 = arith.constant 0 : i32
    return %arg0, %arg1, %c0_i32 : i32, i32, i32
  }
  func.func @transform_2(%arg0: i32, %arg1: i32) -> (i32, i32) {
    %c0_i32 = arith.constant 0 : i32
    return %arg0, %arg1 : i32, i32
  }
}

</mosaic_0001>

<bundles_post_ra>
// kernel: tpu_custom_call.1
= control target key start
LH: loop header
LB: loop body
LE: loop exit
PB: predicated region body
PF: predicated region fallthrough
CT: control target
= control target key end

     0   :  { %7 = vsyncpa [#allocation3], 0  ;;  %s297_s0 = inlined_call_operand.hbm [shape: f32[8,32], index: 0, kind: input, shape index: {}]   ;;  %s298_s1 = inlined_call_operand.hbm [shape: f32[8,8,32], index: 1, kind: input, shape index: {}]   ;;  %s299_s2 = inlined_call_operand.hbm [shape: f32[8,8], index: 2, kind: output, shape index: {}]  }
   0x1   :  { %8 = vsyncpa [#allocation6], 0 }
   0x2   :  { %9 = vsyncpa [#allocation4], 0  ;;  %s15_s11 = sshll.u32 %s297_s0, 4  ;;  %s260_s12 = smov [#allocation2]   ;;  %s16_s11 = int_to_ptr.hbm [resolvable:$true] %s15_s11 }
   0x3   :  { %s17_s13 = sshll.u32 %s260_s12, 4  ;;  %s25_s16 = sshll.u32 %s298_s1, 4  ;;  %s18_s13 = int_to_ptr.vmem [resolvable:$true] %s17_s13  ;;  %s26_s16 = int_to_ptr.hbm [resolvable:$true] %s25_s16 }
   0x4   :  { %20 = dma.hbm_to_vmem [thread:$0]  %s16_s11, 128, %s18_s13, [#allocation3]  }
   0x5   :  { %s261_s17 = smov [#allocation5]   ;;  %s262_s19 = smov 128  }
   0x6   :  { %s27_s18 = sshll.u32 %s261_s17, 4  ;;  %s263_s20 = smov 8   ;;  %s28_s18 = int_to_ptr.vmem [resolvable:$true] %s27_s18 }
   0x7   :  { %33 = dma.hbm_to_vmem [thread:$0]  %s26_s16, 1024, %s28_s18, [#allocation6], %s262_s19, %s262_s19, %s263_s20  }
   0x8   :  { %254 = dma.done.wait [#allocation3], 128  }
   0x9   :  { %255 = vsyncadd [#allocation3], 4294967168 }
   0xa   :  { %256 = dma.done.wait [#allocation6], 1024  }
   0xb   :  { %257 = vsyncadd [#allocation6], 4294966272  ;;  %v42_v0 = vld [vmem:[#allocation2] sm:$0xff]  ;;  %v43_v1 = vld [vmem:[#allocation5] sm:$0xff]  ;;  %vm91_vm0 = vcmask 261120   ;;  %v132_v51 = vlaneseq  ;;  %vm142_vm1 = vcmask 1041409  }
   0xc   :  { %v59_v2 = vperm.slane %v42_v0, 0  ;;  %v53_v3 = vrot.slane %v42_v0, 2  ;;  %v55_v4 = vrot.slane %v42_v0, 4  ;;  %v52_v5 = vrot.slane %v42_v0, 1  ;;  %v45_v6 = vld [vmem:[#allocation5 + $0x10] sm:$0xff]  ;;  %v47_v7 = vld [vmem:[#allocation5 + $0x20] sm:$0xff] }
   0xd   :  { %v44_v8 = vld [vmem:[#allocation5 + $0x8] sm:$0xff]  ;;  %v54_v9 = vrot.slane %v42_v0, 3  ;;  %v56_v10 = vrot.slane %v42_v0, 5  ;;  %v46_v15 = vld [vmem:[#allocation5 + $0x18] sm:$0xff]  ;;  %v57_v19 = vrot.slane %v42_v0, 6  ;;  %v58_v25 = vrot.slane %v42_v0, 7 }
   0xe   :  { %v75_v11 = vsub.f32 %v59_v2, %v43_v1  ;;  %v61_v12 = vperm.slane %v53_v3, 0  ;;  %v63_v13 = vperm.slane %v55_v4, 0  ;;  %v60_v14 = vperm.slane %v52_v5, 0  ;;  %v48_v17 = vld [vmem:[#allocation5 + $0x28] sm:$0xff]  ;;  %v49_v34 = vld [vmem:[#allocation5 + $0x30] sm:$0xff]  ;;  %v50_v38 = vld [vmem:[#allocation5 + $0x38] sm:$0xff] }
   0xf   :  { %v62_v16 = vperm.slane %v54_v9, 0  ;;  %v64_v18 = vperm.slane %v56_v10, 0  ;;  %v65_v33 = vperm.slane %v57_v19, 0  ;;  %v66_v37 = vperm.slane %v58_v25, 0  ;;  %s264_s0 = smov [#allocation7]   ;;  %s166_s23 = sshll.u32 %s299_s2, 4  ;;  %s167_s23 = int_to_ptr.hbm [resolvable:$true] %s166_s23 }
  0x10   :  { %v83_v20 = vand.u32 2147483647, %v75_v11  ;;  %v77_v21 = vsub.f32 %v61_v12, %v45_v6  ;;  %v79_v22 = vsub.f32 %v63_v13, %v47_v7  ;;  %v76_v23 = vsub.f32 %v60_v14, %v44_v8  ;;  %s164_s1 = sshll.u32 %s264_s0, 4  ;;  %s165_s1 = int_to_ptr.vmem [resolvable:$true] %s164_s1 }
  0x11   :  { %v78_v24 = vsub.f32 %v62_v16, %v46_v15  ;;  %v80_v29 = vsub.f32 %v64_v18, %v48_v17  ;;  %v81_v40 = vsub.f32 %v65_v33, %v49_v34  ;;  %v82_v43 = vsub.f32 %v66_v37, %v50_v38 }
  0x12   :  { %v92_v26 = vsel %vm91_vm0, %v83_v20, 0.0  ;;  %v85_v27 = vand.u32 2147483647, %v77_v21  ;;  %v87_v28 = vand.u32 2147483647, %v79_v22  ;;  %v133_v52 = vand.u32 127, %v132_v51 }
  0x13   :  { %93 = vadd.xlane.f32.xlu0 %v92_v26  ;;  %v84_v32 = vand.u32 2147483647, %v76_v23  ;;  %v86_v35 = vand.u32 2147483647, %v78_v24  ;;  %v88_v36 = vand.u32 2147483647, %v80_v29 }
  0x14   :  { %v98_v30 = vsel %vm91_vm0, %v85_v27, 0.0  ;;  %v104_v31 = vsel %vm91_vm0, %v87_v28, 0.0  ;;  %v89_v44 = vand.u32 2147483647, %v81_v40  ;;  %v90_v45 = vand.u32 2147483647, %v82_v43 }
  0x15   :  { %99 = vadd.xlane.f32.xlu1 %v98_v30  ;;  %105 = vadd.xlane.f32.xlu2 %v104_v31  ;;  %v95_v39 = vsel %vm91_vm0, %v84_v32, 0.0  ;;  %v101_v41 = vsel %vm91_vm0, %v86_v35, 0.0  ;;  %v107_v42 = vsel %vm91_vm0, %v88_v36, 0.0  ;;  %vm144_vm2 = vcmask 1042434  }
  0x16   :  { %v110_v46 = vsel %vm91_vm0, %v89_v44, 0.0  ;;  %v113_v47 = vsel %vm91_vm0, %v90_v45, 0.0  ;;  %vm146_vm3 = vcmask 1043459   ;;  %vm148_vm4 = vcmask 1044484  }
  0x17   :  { %vm150_vm5 = vcmask 1045509   ;;  %vm152_vm6 = vcmask 1046534   ;;  %vm154_vm7 = vcmask 1047559   ;;  %vm157_vm8 = vcmask 64512  }
  0x1b   :  { %96 = vadd.xlane.f32.xlu0 %v95_v39 }
  0x1d   :  { %102 = vadd.xlane.f32.xlu1 %v101_v41  ;;  %108 = vadd.xlane.f32.xlu2 %v107_v42 }
  0x23   :  { %111 = vadd.xlane.f32.xlu0 %v110_v46 }
  0x25   :  { %114 = vadd.xlane.f32.xlu1 %v113_v47 }
  0x86   :  { %v94_v48 = vpop.xlane.xlu0 %93 }
  0x87   :  { %v116_v53 = vsub.f32 12.0, %v94_v48 }
  0x88   :  { %v100_v49 = vpop.xlane.xlu1 %99  ;;  %v106_v50 = vpop.xlane.xlu2 %105 }
  0x89   :  { %v118_v54 = vsub.f32 12.0, %v100_v49  ;;  %v134_v59 = vperm.slane %v116_v53, %v133_v52  ;;  %v120_v60 = vsub.f32 12.0, %v106_v50 }
  0x8b   :  { %v136_v63 = vperm.slane %v118_v54, %v133_v52  ;;  %v138_v4 = vperm.slane %v120_v60, %v133_v52 }
  0x8e   :  { %v97_v55 = vpop.xlane.xlu0 %96 }
  0x8f   :  { %v117_v56 = vsub.f32 12.0, %v97_v55 }
  0x90   :  { %v103_v57 = vpop.xlane.xlu1 %102  ;;  %v109_v58 = vpop.xlane.xlu2 %108 }
  0x91   :  { %v135_v61 = vperm.slane %v117_v56, %v133_v52  ;;  %v119_v62 = vsub.f32 12.0, %v103_v57  ;;  %v121_v0 = vsub.f32 12.0, %v109_v58 }
  0x93   :  { %v143_v1 = vsel %vm142_vm1, %v135_v61, %v134_v59  ;;  %v137_v2 = vperm.slane %v119_v62, %v133_v52  ;;  %v139_v6 = vperm.slane %v121_v0, %v133_v52 }
  0x94   :  { %v145_v3 = vsel %vm144_vm2, %v136_v63, %v143_v1 }
  0x95   :  { %v147_v5 = vsel %vm146_vm3, %v137_v2, %v145_v3 }
  0x96   :  { %v112_v7 = vpop.xlane.xlu0 %111  ;;  %v149_v8 = vsel %vm148_vm4, %v138_v4, %v147_v5 }
  0x97   :  { %v122_v9 = vsub.f32 12.0, %v112_v7  ;;  %v151_v13 = vsel %vm150_vm5, %v139_v6, %v149_v8 }
  0x98   :  { %v115_v10 = vpop.xlane.xlu1 %114 }
  0x99   :  { %v140_v11 = vperm.slane %v122_v9, %v133_v52  ;;  %v123_v12 = vsub.f32 12.0, %v115_v10 }
  0x9b   :  { %v153_v14 = vsel %vm152_vm6, %v140_v11, %v151_v13  ;;  %v141_v15 = vperm.slane %v123_v12, %v133_v52 }
  0x9d   :  { %v155_v16 = vsel %vm154_vm7, %v141_v15, %v153_v14 }
  0x9e   :  { %158 = vst.msk [vmem:[#allocation7] sm:$0xff] %vm157_vm8, %v155_v16 }
  0x9f   :  { %169 = dma.vmem_to_hbm [thread:$0]  %s165_s1, 128, %s167_s23, [#allocation4]  }
  0xa0   :  { %258 = dma.done.wait [#allocation4], 128  }
  0xa1   :  { %259 = vsyncadd [#allocation4], 4294967168 }
  0xa2   :  { %174 = vsyncpa [#allocation3], 1 }
  0xa3   :  { %175 = vsyncpa [#allocation6], 1 }
  0xa4   :  { %176 = vsyncpa [#allocation4], 1 }

</bundles_post_ra>
